<compile_context>
chip_gen: v7x
topology: tpu7x:2x2x1
jax: 0.10.0
libtpu: 0.0.40
codegen_flags: <defaults>
</compile_context>

<pallas_src>
from functools import partial

import jax
import jax.numpy as jnp
from jax.experimental import pallas as pl
from jax.experimental.pallas import tpu as pltpu


def diet_kernel(x_ref, xt_ref, ue_ref, ur_ref,
                w_er1t_ref, b_er1_ref,
                w_e2t_ref, b_e2_ref,
                w_l2t_ref, b_l2_ref,
                w_r2_ref, b_r2_ref,
                y_ref, xhat_ref, *, emb):
    f32 = jnp.float32
    x = x_ref[...]            # (B, N)
    xt = xt_ref[...]          # (N, S)

    # ---- fused hyper-network first stage: [e1 | r1] in one MXU pass ----
    # er = relu(x_t @ [w_e1^T | w_r1^T] + [b_e1 | b_r1])       -> (N, 2E)
    # TODO(synk): dropout (p=0.2) omitted — identity in eval / use_dropout=False
    er = jnp.dot(xt, w_er1t_ref[...], preferred_element_type=f32) + b_er1_ref[...]
    er = jnp.maximum(er, 0.0)
    a_e = er[:, :emb]         # relu(aux_e1(x_t))  (N, E)
    a_r = er[:, emb:]         # relu(aux_r1(x_t))  (N, E)

    # ---- h = relu((x*Ue) @ We), reassociated (We never materialized) ----
    xu = x * ue_ref[...]                                                   # (B, N)
    t_e = jnp.dot(xu, a_e, preferred_element_type=f32)                     # (B, E)
    h = jnp.dot(t_e, w_e2t_ref[...], preferred_element_type=f32)           # (B, H)
    h = h + jnp.sum(xu, axis=-1, keepdims=True) * b_e2_ref[...]            # rank-1 b_e2
    h = jnp.maximum(h, 0.0)

    # ---- y = l2(h)  (output columns zero-padded to 128 -> unmasked store) ----
    y_ref[...] = jnp.dot(h, w_l2t_ref[...], preferred_element_type=f32) + bl2_bcast(b_l2_ref)

    # ---- x_hat = sigmoid(Ur * (h @ Wr^T)), reassociated (Wr never materialized) ----
    t_r = jnp.dot(h, w_r2_ref[...], preferred_element_type=f32)            # (B, E)
    hw = jax.lax.dot_general(t_r, a_r, (((1,), (1,)), ((), ())),
                             preferred_element_type=f32)                   # (B, N)
    hw = hw + jnp.sum(h * b_r2_ref[...], axis=-1, keepdims=True)           # rank-1 b_r2
    xhat_ref[...] = jax.nn.sigmoid(ur_ref[...] * hw)


def bl2_bcast(b_l2_ref):
    # Trivial helper so the bias read stays a single (1, O_pad) row load.
    return b_l2_ref[...]


def prepare_params(params, *, out_pad=128):
    """One-time (hoisted) weight preprocessing: transpose, cast, fuse, pad."""
    f32 = jnp.float32
    E = params["w_e2"].shape[1]      # embedding size
    H = params["w_l2"].shape[1]      # hidden size
    O = params["w_l2"].shape[0]      # output size

    # Fused hyper-net stage-1 weights: (S, 2E) and (1, 2E).
    w_er1_t = jnp.concatenate(
        [params["w_e1"].T, params["w_r1"].T], axis=1).astype(f32)
    b_er1 = jnp.concatenate(
        [params["b_e1"], params["b_r1"]]).reshape(1, -1).astype(f32)

    # Lane-dense l2 head: pad O -> out_pad columns with zeros.
    O_pad = max(out_pad, O)
    w_l2_t = jnp.zeros((H, O_pad), f32).at[:, :O].set(params["w_l2"].T.astype(f32))
    b_l2 = jnp.zeros((1, O_pad), f32).at[:, :O].set(
        params["b_l2"].reshape(1, -1).astype(f32))

    return {
        "Ue": params["Ue"].astype(f32),                      # (1, N)
        "Ur": params["Ur"].astype(f32),                      # (1, N)
        "w_er1_t": w_er1_t, "b_er1": b_er1,                  # (S, 2E), (1, 2E)
        "w_e2_t": params["w_e2"].T.astype(f32),              # (E, H)
        "b_e2": params["b_e2"].reshape(1, -1).astype(f32),   # (1, H)
        "w_l2_t": w_l2_t, "b_l2": b_l2,                      # (H, 128), (1, 128)
        "w_r2": params["w_r2"].astype(f32),                  # (H, E) (no transpose needed)
        "b_r2": params["b_r2"].reshape(1, -1).astype(f32),   # (1, H)
        "emb": E, "out": O,
    }


@partial(jax.jit, static_argnames=("emb", "out"))
def _forward_impl(x, x_t, Ue, Ur, w_er1_t, b_er1, w_e2_t, b_e2,
                  w_l2_t, b_l2, w_r2, b_r2, *, emb, out):
    f32 = jnp.float32
    B, N = x.shape
    O_pad = w_l2_t.shape[1]

    vmem = pl.BlockSpec(memory_space=pltpu.MemorySpace.VMEM)
    y_pad, x_hat = pl.pallas_call(
        partial(diet_kernel, emb=emb),
        out_shape=(jax.ShapeDtypeStruct((B, O_pad), f32),
                   jax.ShapeDtypeStruct((B, N), f32)),
        in_specs=[vmem] * 12,
        out_specs=(vmem, vmem),
        compiler_params=pltpu.CompilerParams(vmem_limit_bytes=32 << 20),
    )(x.astype(f32), x_t.astype(f32), Ue, Ur, w_er1_t, b_er1,
      w_e2_t, b_e2, w_l2_t, b_l2, w_r2, b_r2)
    return y_pad[:, :out], x_hat


def modified_diet_networks_forward(x, x_t, prepped):
    return _forward_impl(
        x, x_t,
        prepped["Ue"], prepped["Ur"],
        prepped["w_er1_t"], prepped["b_er1"],
        prepped["w_e2_t"], prepped["b_e2"],
        prepped["w_l2_t"], prepped["b_l2"],
        prepped["w_r2"], prepped["b_r2"],
        emb=prepped["emb"], out=prepped["out"])


def _reference(x, x_t, p):
    """Plain-JAX reference of the PyTorch forward (use_dropout=False)."""
    e1 = jnp.maximum(x_t @ p["w_e1"].T + p["b_e1"], 0.0)
    We = e1 @ p["w_e2"].T + p["b_e2"]
    h = jnp.maximum((x * p["Ue"]) @ We, 0.0)
    y = h @ p["w_l2"].T + p["b_l2"]
    r1 = jnp.maximum(x_t @ p["w_r1"].T + p["b_r1"], 0.0)
    Wr = r1 @ p["w_r2"].T + p["b_r2"]
    x_hat = jax.nn.sigmoid(p["Ur"] * (h @ Wr.T))
    return y, x_hat


if __name__ == "__main__":
    # Module hyper-parameters (small, consistent with forward()):
    B = 8            # batch
    N = 256          # input_size  (num features)
    S = 64           # sample_size
    E = 32           # embedding_size
    H = 32           # hidden_size
    O = 16           # output_size

    key = jax.random.PRNGKey(0)
    ks = jax.random.split(key, 12)

    def uni(k, shape, scale=0.1):
        return jax.random.uniform(k, shape, jnp.float32, -scale, scale)

    params = {
        "Ue": jax.random.uniform(ks[0], (1, N), jnp.float32),   # torch.rand(1, N)
        "Ur": jnp.ones((1, N), jnp.float32),                    # torch.ones(1, N)
        "w_e1": uni(ks[1], (E, S)), "b_e1": uni(ks[2], (E,)),
        "w_e2": uni(ks[3], (H, E)), "b_e2": uni(ks[4], (H,)),
        "w_l2": uni(ks[5], (O, H)), "b_l2": uni(ks[6], (O,)),
        "w_r1": uni(ks[7], (E, S)), "b_r1": uni(ks[8], (E,)),
        "w_r2": uni(ks[9], (H, E)), "b_r2": uni(ks[10], (H,)),
    }

    x = jax.random.normal(ks[11], (B, N), jnp.float32)
    x_t = jax.random.normal(jax.random.fold_in(key, 99), (N, S), jnp.float32)

    prepped = prepare_params(params)                 # hoisted one-time preprocessing
    y, x_hat = modified_diet_networks_forward(x, x_t, prepped)
    jax.block_until_ready((y, x_hat))

    y_ref, x_hat_ref = _reference(x, x_t, params)
    assert y.shape == (B, O) and x_hat.shape == (B, N)
    assert jnp.allclose(y, y_ref, atol=1e-4, rtol=1e-4)
    assert jnp.allclose(x_hat, x_hat_ref, atol=1e-4, rtol=1e-4)

    print("KERNEL_OK")
</pallas_src>

<mosaic_0001>
module attributes {stable_mosaic.version = 11 : i64} {
  func.func @diet_kernel(%arg0: memref<8x256xf32, #tpu.memory_space<vmem>>, %arg1: memref<256x64xf32, #tpu.memory_space<vmem>>, %arg2: memref<1x256xf32, #tpu.memory_space<vmem>>, %arg3: memref<1x256xf32, #tpu.memory_space<vmem>>, %arg4: memref<64x64xf32, #tpu.memory_space<vmem>>, %arg5: memref<1x64xf32, #tpu.memory_space<vmem>>, %arg6: memref<32x32xf32, #tpu.memory_space<vmem>>, %arg7: memref<1x32xf32, #tpu.memory_space<vmem>>, %arg8: memref<32x128xf32, #tpu.memory_space<vmem>>, %arg9: memref<1x128xf32, #tpu.memory_space<vmem>>, %arg10: memref<32x32xf32, #tpu.memory_space<vmem>>, %arg11: memref<1x32xf32, #tpu.memory_space<vmem>>, %arg12: memref<8x128xf32, #tpu.memory_space<vmem>>, %arg13: memref<8x256xf32, #tpu.memory_space<vmem>>) attributes {dimension_semantics = [], scalar_prefetch = 0 : i64, scratch_operands = 0 : i64, tpu.core_type = #tpu.core_type<tc>} {
    %c0 = arith.constant 0 : index
    %c0_0 = arith.constant 0 : index
    %0 = vector.load %arg0[%c0, %c0_0] : memref<8x256xf32, #tpu.memory_space<vmem>>, vector<8x256xf32>
    %c0_1 = arith.constant 0 : index
    %c0_2 = arith.constant 0 : index
    %1 = vector.load %arg1[%c0_1, %c0_2] : memref<256x64xf32, #tpu.memory_space<vmem>>, vector<256x64xf32>
    %c0_3 = arith.constant 0 : index
    %c0_4 = arith.constant 0 : index
    %2 = vector.load %arg4[%c0_3, %c0_4] : memref<64x64xf32, #tpu.memory_space<vmem>>, vector<64x64xf32>
    %cst = arith.constant dense<0.000000e+00> : vector<256x64xf32>
    %3 = tpu.matmul %1, %2, %cst {dimension_numbers = #tpu.dot_dimension_numbers<[1], [0], [0], [1], [0, 0, 1, 1], [], []>} : vector<256x64xf32>, vector<64x64xf32>, vector<256x64xf32> -> vector<256x64xf32>
    %c0_5 = arith.constant 0 : index
    %c0_6 = arith.constant 0 : index
    %4 = vector.load %arg5[%c0_5, %c0_6] : memref<1x64xf32, #tpu.memory_space<vmem>>, vector<1x64xf32>
    %5 = vector.broadcast %4 : vector<1x64xf32> to vector<256x64xf32>
    %6 = arith.addf %3, %5 : vector<256x64xf32>
    %cst_7 = arith.constant 0.000000e+00 : f32
    %7 = vector.broadcast %cst_7 : f32 to vector<256x64xf32>
    %8 = arith.maximumf %6, %7 : vector<256x64xf32>
    %9 = vector.extract_strided_slice %8 {offsets = [0, 0], sizes = [256, 32], strides = [1, 1]} : vector<256x64xf32> to vector<256x32xf32>
    %10 = vector.extract_strided_slice %8 {offsets = [0, 32], sizes = [256, 32], strides = [1, 1]} : vector<256x64xf32> to vector<256x32xf32>
    %c0_8 = arith.constant 0 : index
    %c0_9 = arith.constant 0 : index
    %11 = vector.load %arg2[%c0_8, %c0_9] : memref<1x256xf32, #tpu.memory_space<vmem>>, vector<1x256xf32>
    %12 = vector.broadcast %11 : vector<1x256xf32> to vector<8x256xf32>
    %13 = arith.mulf %0, %12 : vector<8x256xf32>
    %cst_10 = arith.constant dense<0.000000e+00> : vector<8x32xf32>
    %14 = tpu.matmul %13, %9, %cst_10 {dimension_numbers = #tpu.dot_dimension_numbers<[1], [0], [0], [1], [0, 0, 1, 1], [], []>} : vector<8x256xf32>, vector<256x32xf32>, vector<8x32xf32> -> vector<8x32xf32>
    %c0_11 = arith.constant 0 : index
    %c0_12 = arith.constant 0 : index
    %15 = vector.load %arg6[%c0_11, %c0_12] : memref<32x32xf32, #tpu.memory_space<vmem>>, vector<32x32xf32>
    %cst_13 = arith.constant dense<0.000000e+00> : vector<8x32xf32>
    %16 = tpu.matmul %14, %15, %cst_13 {dimension_numbers = #tpu.dot_dimension_numbers<[1], [0], [0], [1], [0, 0, 1, 1], [], []>} : vector<8x32xf32>, vector<32x32xf32>, vector<8x32xf32> -> vector<8x32xf32>
    %cst_14 = arith.constant dense<0.000000e+00> : vector<8xf32>
    %17 = vector.multi_reduction <add>, %13, %cst_14 [1] : vector<8x256xf32> to vector<8xf32>
    %18 = vector.shape_cast %17 : vector<8xf32> to vector<8x1xf32>
    %c0_15 = arith.constant 0 : index
    %c0_16 = arith.constant 0 : index
    %19 = vector.load %arg7[%c0_15, %c0_16] : memref<1x32xf32, #tpu.memory_space<vmem>>, vector<1x32xf32>
    %20 = vector.broadcast %18 : vector<8x1xf32> to vector<8x32xf32>
    %21 = vector.broadcast %19 : vector<1x32xf32> to vector<8x32xf32>
    %22 = arith.mulf %20, %21 : vector<8x32xf32>
    %23 = arith.addf %16, %22 : vector<8x32xf32>
    %cst_17 = arith.constant 0.000000e+00 : f32
    %24 = vector.broadcast %cst_17 : f32 to vector<8x32xf32>
    %25 = arith.maximumf %23, %24 : vector<8x32xf32>
    %c0_18 = arith.constant 0 : index
    %c0_19 = arith.constant 0 : index
    %26 = vector.load %arg8[%c0_18, %c0_19] : memref<32x128xf32, #tpu.memory_space<vmem>>, vector<32x128xf32>
    %cst_20 = arith.constant dense<0.000000e+00> : vector<8x128xf32>
    %27 = tpu.matmul %25, %26, %cst_20 {dimension_numbers = #tpu.dot_dimension_numbers<[1], [0], [0], [1], [0, 0, 1, 1], [], []>} : vector<8x32xf32>, vector<32x128xf32>, vector<8x128xf32> -> vector<8x128xf32>
    %c0_21 = arith.constant 0 : index
    %c0_22 = arith.constant 0 : index
    %28 = vector.load %arg9[%c0_21, %c0_22] : memref<1x128xf32, #tpu.memory_space<vmem>>, vector<1x128xf32>
    %29 = vector.broadcast %28 : vector<1x128xf32> to vector<8x128xf32>
    %30 = arith.addf %27, %29 : vector<8x128xf32>
    %c0_23 = arith.constant 0 : index
    %c0_24 = arith.constant 0 : index
    %31 = vector.load %arg12[%c0_23, %c0_24] : memref<8x128xf32, #tpu.memory_space<vmem>>, vector<8x128xf32>
    tpu.vector_store %arg12[%c0_23, %c0_24], %30 {strides = array<i32>} : memref<8x128xf32, #tpu.memory_space<vmem>>, vector<8x128xf32>,
    %c0_25 = arith.constant 0 : index
    %c0_26 = arith.constant 0 : index
    %32 = vector.load %arg10[%c0_25, %c0_26] : memref<32x32xf32, #tpu.memory_space<vmem>>, vector<32x32xf32>
    %cst_27 = arith.constant dense<0.000000e+00> : vector<8x32xf32>
    %33 = tpu.matmul %25, %32, %cst_27 {dimension_numbers = #tpu.dot_dimension_numbers<[1], [0], [0], [1], [0, 0, 1, 1], [], []>} : vector<8x32xf32>, vector<32x32xf32>, vector<8x32xf32> -> vector<8x32xf32>
    %cst_28 = arith.constant dense<0.000000e+00> : vector<8x256xf32>
    %34 = tpu.matmul %33, %10, %cst_28 {dimension_numbers = #tpu.dot_dimension_numbers<[1], [1], [0], [0], [0, 0, 1, 0], [], []>} : vector<8x32xf32>, vector<256x32xf32>, vector<8x256xf32> -> vector<8x256xf32>
    %c0_29 = arith.constant 0 : index
    %c0_30 = arith.constant 0 : index
    %35 = vector.load %arg11[%c0_29, %c0_30] : memref<1x32xf32, #tpu.memory_space<vmem>>, vector<1x32xf32>
    %36 = vector.broadcast %35 : vector<1x32xf32> to vector<8x32xf32>
    %37 = arith.mulf %25, %36 : vector<8x32xf32>
    %cst_31 = arith.constant dense<0.000000e+00> : vector<8xf32>
    %38 = vector.multi_reduction <add>, %37, %cst_31 [1] : vector<8x32xf32> to vector<8xf32>
    %39 = vector.shape_cast %38 : vector<8xf32> to vector<8x1xf32>
    %40 = vector.broadcast %39 : vector<8x1xf32> to vector<8x256xf32>
    %41 = arith.addf %34, %40 : vector<8x256xf32>
    %c0_32 = arith.constant 0 : index
    %c0_33 = arith.constant 0 : index
    %42 = vector.load %arg3[%c0_32, %c0_33] : memref<1x256xf32, #tpu.memory_space<vmem>>, vector<1x256xf32>
    %43 = vector.broadcast %42 : vector<1x256xf32> to vector<8x256xf32>
    %44 = arith.mulf %43, %41 : vector<8x256xf32>
    %45 = arith.negf %44 : vector<8x256xf32>
    %46 = math.exp %45 : vector<8x256xf32>
    %cst_34 = arith.constant 1.000000e+00 : f32
    %47 = vector.broadcast %cst_34 : f32 to vector<8x256xf32>
    %48 = arith.addf %47, %46 : vector<8x256xf32>
    %49 = arith.divf %47, %48 : vector<8x256xf32>
    %c0_35 = arith.constant 0 : index
    %c0_36 = arith.constant 0 : index
    %50 = vector.load %arg13[%c0_35, %c0_36] : memref<8x256xf32, #tpu.memory_space<vmem>>, vector<8x256xf32>
    tpu.vector_store %arg13[%c0_35, %c0_36], %49 {strides = array<i32>} : memref<8x256xf32, #tpu.memory_space<vmem>>, vector<8x256xf32>,
    return
  }
}

</mosaic_0001>

<bundles_post_ra>
// kernel: _forward_impl.1
= control target key start
LH: loop header
LB: loop body
LE: loop exit
PB: predicated region body
PF: predicated region fallthrough
CT: control target
= control target key end

     0   :  { %19 = vsyncpa [#allocation3], 0  ;;  %vm94_vm0 = vcmask 523264   ;;  %s2115_s0 = inlined_call_operand.vmem [shape: f32[8,256], index: 0, kind: input, shape index: {}]   ;;  %s2116_s1 = inlined_call_operand.vmem [shape: f32[256,64], index: 1, kind: input, shape index: {}]   ;;  %s2117_s2 = inlined_call_operand.vmem [shape: f32[1,256], index: 2, kind: input, shape index: {}]   ;;  %s2118_s3 = inlined_call_operand.vmem [shape: f32[1,256], index: 3, kind: input, shape index: {}]   ;;  %s2119_s4 = inlined_call_operand.vmem [shape: f32[64,64], index: 4, kind: input, shape index: {}]   ;;  %s2120_s5 = inlined_call_operand.vmem [shape: f32[1,64], index: 5, kind: input, shape index: {}]   ;;  %s2121_s6 = inlined_call_operand.vmem [shape: f32[32,32], index: 6, kind: input, shape index: {}]   ;;  %s2122_s7 = inlined_call_operand.vmem [shape: f32[1,32], index: 7, kind: input, shape index: {}]   ;;  %s2123_s8 = inlined_call_operand.vmem [shape: f32[32,128], index: 8, kind: input, shape index: {}]   ;;  %s2124_s9 = inlined_call_operand.vmem [shape: f32[1,128], index: 9, kind: input, shape index: {}]   ;;  %s2125_s10 = inlined_call_operand.vmem [shape: f32[32,32], index: 10, kind: input, shape index: {}]   ;;  %s2126_s11 = inlined_call_operand.vmem [shape: f32[1,32], index: 11, kind: input, shape index: {}]   ;;  %s2127_s12 = inlined_call_operand.hbm [shape: f32[8,128], index: 12, kind: output, shape index: {0}]   ;;  %s2128_s13 = inlined_call_operand.hbm [shape: f32[8,256], index: 13, kind: output, shape index: {1}]  }
   0x1   :  { %v79_v0 = vld [vmem:[%s2119_s4] sm:$0xff]  ;;  %v80_v1 = vld [vmem:[%s2119_s4 + $0x8] sm:$0xff]  ;;  %v81_v2 = vld [vmem:[%s2119_s4 + $0x10] sm:$0xff] }
   0x2   :  { %v1377_v3 = vpack.c.bf16 %v80_v1, %v79_v0  ;;  %v82_v4 = vld [vmem:[%s2119_s4 + $0x18] sm:$0xff]  ;;  %v83_v6 = vld [vmem:[%s2119_s4 + $0x20] sm:$0xff]  ;;  %v84_v7 = vld [vmem:[%s2119_s4 + $0x28] sm:$0xff] }
   0x3   :  { %v1381_v5 = vpack.c.bf16 %v82_v4, %v81_v2  ;;  %v47_v8 = vld [vmem:[%s2116_s1] sm:$0xff]  ;;  %v1385_v9 = vpack.c.bf16 %v84_v7, %v83_v6  ;;  %v85_v10 = vld [vmem:[%s2119_s4 + $0x30] sm:$0xff]  ;;  %v86_v11 = vld [vmem:[%s2119_s4 + $0x38] sm:$0xff] }
   0x4   :  { %1378 = vmatprep.subr.bf16.mxu0 %v1377_v3  ;;  %1296 = vmatprep.mubr.msk.f32.mxu0 %vm94_vm0, %v47_v8  ;;  %v1389_v12 = vpack.c.bf16 %v86_v11, %v85_v10 }
   0x5   :  { %1380 = vmatpush3.bf16.msra.mxu0 %v1377_v3 }
   0x6   :  { %1382 = vmatprep.subr.bf16.mxu0 %v1381_v5 }
   0x9   :  { %1384 = vmatpush3.bf16.msra.mxu0 %v1381_v5 }
   0xa   :  { %1386 = vmatprep.subr.bf16.mxu0 %v1385_v9 }
   0xd   :  { %1388 = vmatpush3.bf16.msra.mxu0 %v1385_v9 }
   0xe   :  { %1390 = vmatprep.subr.bf16.mxu0 %v1389_v12 }
   0xf   :  { %20 = vsyncpa [#allocation5], 0  ;;  %v48_v13 = vld [vmem:[%s2116_s1 + $0x8] sm:$0xff]  ;;  %v49_v14 = vld [vmem:[%s2116_s1 + $0x10] sm:$0xff]  ;;  %v450_v44 = vlaneseq  ;;  %vm547_vm1 = vcmask 261120   ;;  %vm1635_vm3 = vmmov 0  }
  0x10   :  { %v50_v15 = vld [vmem:[%s2116_s1 + $0x18] sm:$0xff]  ;;  %v51_v16 = vld [vmem:[%s2116_s1 + $0x20] sm:$0xff]  ;;  %v52_v17 = vld [vmem:[%s2116_s1 + $0x28] sm:$0xff] }
  0x11   :  { %1392 = vmatpush3.bf16.msra.mxu0 %v1389_v12  ;;  %v53_v18 = vld [vmem:[%s2116_s1 + $0x30] sm:$0xff]  ;;  %v54_v19 = vld [vmem:[%s2116_s1 + $0x38] sm:$0xff]  ;;  %v55_v20 = vld [vmem:[%s2116_s1 + $0x40] sm:$0xff]  ;;  %v1861_v45 = vshrl.u32 %v450_v44, 7 }
  0x12   :  { %v56_v21 = vld [vmem:[%s2116_s1 + $0x48] sm:$0xff]  ;;  %v57_v22 = vld [vmem:[%s2116_s1 + $0x50] sm:$0xff]  ;;  %v58_v23 = vld [vmem:[%s2116_s1 + $0x58] sm:$0xff] }
  0x13   :  { %v59_v24 = vld [vmem:[%s2116_s1 + $0x60] sm:$0xff]  ;;  %v60_v25 = vld [vmem:[%s2116_s1 + $0x68] sm:$0xff]  ;;  %v61_v26 = vld [vmem:[%s2116_s1 + $0x70] sm:$0xff]  ;;  %v452_v46 = vsub.s32 0, %v1861_v45  ;;  %v456_v47 = vsub.s32 1, %v1861_v45 }
  0x14   :  { %1297 = vmatmul.mubr.msk.f32.vlgmr.msra.gmra.mrb[0].mxu0 %vm94_vm0, %v48_v13  ;;  %v62_v27 = vld [vmem:[%s2116_s1 + $0x78] sm:$0xff]  ;;  %v63_v28 = vld [vmem:[%s2116_s1 + $0x80] sm:$0xff]  ;;  %v64_v29 = vld [vmem:[%s2116_s1 + $0x88] sm:$0xff] }
  0x15   :  { %1299 = vmatprep.mubr.msk.f32.mxu0 %vm94_vm0, %v49_v14  ;;  %v65_v30 = vld [vmem:[%s2116_s1 + $0x90] sm:$0xff]  ;;  %v66_v31 = vld [vmem:[%s2116_s1 + $0x98] sm:$0xff]  ;;  %v67_v32 = vld [vmem:[%s2116_s1 + $0xa0] sm:$0xff] }
  0x16   :  { %v68_v33 = vld [vmem:[%s2116_s1 + $0xa8] sm:$0xff]  ;;  %v69_v34 = vld [vmem:[%s2116_s1 + $0xb0] sm:$0xff]  ;;  %v70_v35 = vld [vmem:[%s2116_s1 + $0xb8] sm:$0xff] }
  0x17   :  { %v71_v36 = vld [vmem:[%s2116_s1 + $0xc0] sm:$0xff]  ;;  %v72_v37 = vld [vmem:[%s2116_s1 + $0xc8] sm:$0xff]  ;;  %v73_v38 = vld [vmem:[%s2116_s1 + $0xd0] sm:$0xff] }
  0x18   :  { %1300 = vmatmul.mubr.msk.f32.gmra.mrb[2].mxu0 %vm94_vm0, %v50_v15  ;;  %v74_v39 = vld [vmem:[%s2116_s1 + $0xd8] sm:$0xff]  ;;  %v75_v40 = vld [vmem:[%s2116_s1 + $0xe0] sm:$0xff]  ;;  %v76_v41 = vld [vmem:[%s2116_s1 + $0xe8] sm:$0xff] }
  0x19   :  { %1302 = vmatprep.mubr.msk.f32.mxu0 %vm94_vm0, %v51_v16  ;;  %v77_v42 = vld [vmem:[%s2116_s1 + $0xf0] sm:$0xff]  ;;  %v78_v43 = vld [vmem:[%s2116_s1 + $0xf8] sm:$0xff]  ;;  %v448_v48 = vld [vmem:[%s2117_s2] sm:$0x3] }
  0x1a   :  { %v453_v49 = vrot.slane %v448_v48, %v452_v46  ;;  %v457_v50 = vrot.slane %v448_v48, %v456_v47  ;;  %v45_v51 = vld [vmem:[%s2115_s0] sm:$0xff]  ;;  %v46_v52 = vld [vmem:[%s2115_s0 + $0x8] sm:$0xff]  ;;  %s1633_s0 = smov 96   ;;  %vm1998_vm2 = vmpackc.low %vm547_vm1, %vm547_vm1 }
  0x1b   :  { %v1884_v56 = vld [vmem:[%s2120_s5] ss:$0 sm:$0xff] }
  0x1c   :  { %1303 = vmatmul.mubr.msk.f32.gmra.mrb[4].mxu0 %vm94_vm0, %v52_v17  ;;  %v1878_v53 = vmul.f32 %v453_v49, %v45_v51  ;;  %v461_v54 = vmul.f32 %v457_v50, %v46_v52 }
  0x1d   :  { %1305 = vmatprep.mubr.msk.f32.mxu0 %vm94_vm0, %v53_v18 }
  0x1e   :  { %v536_v55 = vadd.f32 %v461_v54, %v1878_v53  ;;  %526 = vmatprep.mubr.f32.mxu1 %v461_v54 }
  0x20   :  { %1306 = vmatmul.mubr.msk.f32.gmra.mrb[6].mxu0 %vm94_vm0, %v54_v19  ;;  %537 = vadd.xlane.f32.xlu0 %v536_v55 }
  0x21   :  { %1308 = vmatprep.mubr.msk.f32.mxu0 %vm94_vm0, %v55_v20 }
  0x24   :  { %1309 = vmatmul.mubr.msk.f32.gmra.mrb[8].mxu0 %vm94_vm0, %v56_v21 }
  0x25   :  { %1311 = vmatprep.mubr.msk.f32.mxu0 %vm94_vm0, %v57_v22 }
  0x28   :  { %1312 = vmatmul.mubr.msk.f32.gmra.mrb[10].mxu0 %vm94_vm0, %v58_v23 }
  0x29   :  { %1314 = vmatprep.mubr.msk.f32.mxu0 %vm94_vm0, %v59_v24 }
  0x2c   :  { %1315 = vmatmul.mubr.msk.f32.gmra.mrb[12].mxu0 %vm94_vm0, %v60_v25 }
  0x2d   :  { %1317 = vmatprep.mubr.msk.f32.mxu0 %vm94_vm0, %v61_v26 }
  0x30   :  { %1318 = vmatmul.mubr.msk.f32.gmra.mrb[14].mxu0 %vm94_vm0, %v62_v27 }
  0x31   :  { %1320 = vmatprep.mubr.msk.f32.mxu0 %vm94_vm0, %v63_v28 }
  0x34   :  { %1321 = vmatmul.mubr.msk.f32.gmra.mrb[16].mxu0 %vm94_vm0, %v64_v29 }
  0x35   :  { %1323 = vmatprep.mubr.msk.f32.mxu0 %vm94_vm0, %v65_v30 }
  0x38   :  { %1324 = vmatmul.mubr.msk.f32.gmra.mrb[18].mxu0 %vm94_vm0, %v66_v31 }
  0x39   :  { %1326 = vmatprep.mubr.msk.f32.mxu0 %vm94_vm0, %v67_v32 }
  0x3c   :  { %1327 = vmatmul.mubr.msk.f32.gmra.mrb[20].mxu0 %vm94_vm0, %v68_v33 }
  0x3d   :  { %1329 = vmatprep.mubr.msk.f32.mxu0 %vm94_vm0, %v69_v34 }
  0x40   :  { %1330 = vmatmul.mubr.msk.f32.gmra.mrb[22].mxu0 %vm94_vm0, %v70_v35 }
  0x41   :  { %1332 = vmatprep.mubr.msk.f32.mxu0 %vm94_vm0, %v71_v36 }
  0x44   :  { %1333 = vmatmul.mubr.msk.f32.gmra.mrb[24].mxu0 %vm94_vm0, %v72_v37 }
  0x45   :  { %1335 = vmatprep.mubr.msk.f32.mxu0 %vm94_vm0, %v73_v38 }
  0x48   :  { %1336 = vmatmul.mubr.msk.f32.gmra.mrb[26].mxu0 %vm94_vm0, %v74_v39 }
  0x49   :  { %1338 = vmatprep.mubr.msk.f32.mxu0 %vm94_vm0, %v75_v40 }
  0x4c   :  { %1339 = vmatmul.mubr.msk.f32.gmra.mrb[28].mxu0 %vm94_vm0, %v76_v41 }
  0x4d   :  { %1341 = vmatprep.mubr.msk.f32.mxu0 %vm94_vm0, %v77_v42 }
  0x50   :  { %1342 = vmatmul.mubr.msk.f32.gmra.mrb[30].mxu0 %vm94_vm0, %v78_v43 }
  0xe7   :  { %v1298_v57 = vpop.f32.mrb[0].mxu0 }
  0xe8   :  { %v263_v58 = vadd.f32 %v1298_v57, %v1884_v56  ;;  %v257_v59 = vpop.f32.mrb[1].mxu0 }
  0xe9   :  { %v258_v60 = vadd.f32 %v1884_v56, %v257_v59 }
  0xea   :  { %v417_v61 = vmax.f32 %v263_v58, 0.0 }
  0xeb   :  { %v416_v62 = vmax.f32 %v258_v60, 0.0  ;;  %v1301_v63 = vpop.f32.mrb[2].mxu0 }
  0xec   :  { %v273_v0 = vadd.f32 %v1301_v63, %v1884_v56  ;;  %v267_v1 = vpop.f32.mrb[3].mxu0 }
  0xed   :  { %v268_v2 = vadd.f32 %v1884_v56, %v267_v1  ;;  %v1502_v3 = vpack.i.bf16 %v417_v61, %v416_v62  ;;  %v1890_v4 = vpack.c.bf16 %v417_v61, %v416_v62 }
  0xee   :  { %v419_v5 = vmax.f32 %v273_v0, 0.0 }
  0xef   :  { %v418_v6 = vmax.f32 %v268_v2, 0.0  ;;  %v1304_v7 = vpop.f32.mrb[4].mxu0  ;;  %1503 = vrot.lane.b32.xlu1 %v1502_v3, %s1633_s0 }
  0xf0   :  { %v283_v8 = vadd.f32 %v1304_v7, %v1884_v56  ;;  %v277_v9 = vpop.f32.mrb[5].mxu0 }
  0xf1   :  { %v1894_v10 = vpack.i.bf16 %v419_v5, %v418_v6  ;;  %v1896_v11 = vpack.c.bf16 %v419_v5, %v418_v6  ;;  %v278_v12 = vadd.f32 %v1884_v56, %v277_v9 }
  0xf2   :  { %v421_v13 = vmax.f32 %v283_v8, 0.0 }
  0xf3   :  { %v420_v14 = vmax.f32 %v278_v12, 0.0  ;;  %v1307_v15 = vpop.f32.mrb[6].mxu0 }
  0xf4   :  { %v293_v16 = vadd.f32 %v1307_v15, %v1884_v56  ;;  %v287_v17 = vpop.f32.mrb[7].mxu0 }
  0xf5   :  { %v1900_v18 = vpack.i.bf16 %v421_v13, %v420_v14  ;;  %v1902_v19 = vpack.c.bf16 %v421_v13, %v420_v14  ;;  %v288_v20 = vadd.f32 %v1884_v56, %v287_v17 }
  0xf6   :  { %v423_v21 = vmax.f32 %v293_v16, 0.0 }
  0xf7   :  { %v422_v22 = vmax.f32 %v288_v20, 0.0  ;;  %v1310_v23 = vpop.f32.mrb[8].mxu0 }
  0xf8   :  { %v303_v24 = vadd.f32 %v1310_v23, %v1884_v56  ;;  %v297_v25 = vpop.f32.mrb[9].mxu0 }
  0xf9   :  { %v1906_v26 = vpack.i.bf16 %v423_v21, %v422_v22  ;;  %v1908_v27 = vpack.c.bf16 %v423_v21, %v422_v22  ;;  %v298_v28 = vadd.f32 %v1884_v56, %v297_v25 }
  0xfa   :  { %v425_v29 = vmax.f32 %v303_v24, 0.0 }
  0xfb   :  { %v424_v30 = vmax.f32 %v298_v28, 0.0  ;;  %v1313_v31 = vpop.f32.mrb[10].mxu0 }
  0xfc   :  { %v313_v32 = vadd.f32 %v1313_v31, %v1884_v56  ;;  %v307_v33 = vpop.f32.mrb[11].mxu0 }
  0xfd   :  { %v1912_v34 = vpack.i.bf16 %v425_v29, %v424_v30  ;;  %v1914_v35 = vpack.c.bf16 %v425_v29, %v424_v30  ;;  %v308_v36 = vadd.f32 %v1884_v56, %v307_v33 }
  0xfe   :  { %v427_v37 = vmax.f32 %v313_v32, 0.0 }
  0xff   :  { %v426_v38 = vmax.f32 %v308_v36, 0.0  ;;  %v1316_v39 = vpop.f32.mrb[12].mxu0 }
 0x100   :  { %v323_v40 = vadd.f32 %v1316_v39, %v1884_v56  ;;  %v317_v41 = vpop.f32.mrb[13].mxu0 }
 0x101   :  { %v1918_v42 = vpack.i.bf16 %v427_v37, %v426_v38  ;;  %v1920_v43 = vpack.c.bf16 %v427_v37, %v426_v38  ;;  %v318_v44 = vadd.f32 %v1884_v56, %v317_v41 }
 0x102   :  { %v429_v48 = vmax.f32 %v323_v40, 0.0 }
 0x103   :  { %v428_v49 = vmax.f32 %v318_v44, 0.0  ;;  %v1319_v50 = vpop.f32.mrb[14].mxu0 }
 0x104   :  { %v333_v51 = vadd.f32 %v1319_v50, %v1884_v56  ;;  %v327_v52 = vpop.f32.mrb[15].mxu0 }
 0x105   :  { %v1924_v54 = vpack.i.bf16 %v429_v48, %v428_v49  ;;  %v1926_v55 = vpack.c.bf16 %v429_v48, %v428_v49  ;;  %v328_v57 = vadd.f32 %v1884_v56, %v327_v52 }
 0x106   :  { %v431_v58 = vmax.f32 %v333_v51, 0.0 }
 0x107   :  { %v430_v59 = vmax.f32 %v328_v57, 0.0  ;;  %v1322_v60 = vpop.f32.mrb[16].mxu0 }
 0x108   :  { %v343_v61 = vadd.f32 %v1322_v60, %v1884_v56  ;;  %v337_v62 = vpop.f32.mrb[17].mxu0 }
 0x109   :  { %v1930_v63 = vpack.i.bf16 %v431_v58, %v430_v59  ;;  %v1932_v0 = vpack.c.bf16 %v431_v58, %v430_v59  ;;  %v338_v1 = vadd.f32 %v1884_v56, %v337_v62 }
 0x10a   :  { %v433_v2 = vmax.f32 %v343_v61, 0.0 }
 0x10b   :  { %v432_v3 = vmax.f32 %v338_v1, 0.0  ;;  %v1325_v5 = vpop.f32.mrb[18].mxu0 }
 0x10c   :  { %v353_v6 = vadd.f32 %v1325_v5, %v1884_v56  ;;  %v347_v7 = vpop.f32.mrb[19].mxu0 }
 0x10d   :  { %v1497_v8 = vpack.i.bf16 %v433_v2, %v432_v3  ;;  %v348_v9 = vadd.f32 %v1884_v56, %v347_v7  ;;  %v1393_v12 = vpack.c.bf16 %v433_v2, %v432_v3 }
 0x10e   :  { %v435_v13 = vmax.f32 %v353_v6, 0.0 }
 0x10f   :  { %v434_v14 = vmax.f32 %v348_v9, 0.0  ;;  %v1328_v15 = vpop.f32.mrb[20].mxu0  ;;  %1394 = vmatprep.subr.bf16.mxu1 %v1393_v12  ;;  %1498 = vrot.lane.b32.xlu0 %v1497_v8, %s1633_s0 }
 0x110   :  { %v363_v16 = vadd.f32 %v1328_v15, %v1884_v56  ;;  %v357_v17 = vpop.f32.mrb[21].mxu0  ;;  %1396 = vmatpush3.bf16.msra.mxu1 %v1890_v4 }
 0x111   :  { %v1507_v20 = vpack.i.bf16 %v435_v13, %v434_v14  ;;  %v1397_v21 = vpack.c.bf16 %v435_v13, %v434_v14  ;;  %v358_v22 = vadd.f32 %v1884_v56, %v357_v17  ;;  %v535_v14 = vld [vmem:[%s2121_s6 + $0x18] sm:$0xff] }
 0x112   :  { %v437_v23 = vmax.f32 %v363_v16, 0.0 }
 0x113   :  { %v436_v24 = vmax.f32 %v358_v22, 0.0  ;;  %v1331_v25 = vpop.f32.mrb[22].mxu0  ;;  %1508 = vrot.lane.b32.xlu1 %v1507_v20, %s1633_s0  ;;  %1398 = vmatprep.subr.bf16.mxu1 %v1397_v21  ;;  %v624_v20 = vld [vmem:[%s2123_s8 + $0x10] sm:$0xff] }
 0x114   :  { %v373_v28 = vadd.f32 %v1331_v25, %v1884_v56  ;;  %v367_v29 = vpop.f32.mrb[23].mxu0  ;;  %1400 = vmatpush3.bf16.msra.mxu1 %v1896_v11 }
 0x115   :  { %v1517_v30 = vpack.i.bf16 %v437_v23, %v436_v24  ;;  %v1401_v31 = vpack.c.bf16 %v437_v23, %v436_v24  ;;  %v368_v32 = vadd.f32 %v1884_v56, %v367_v29  ;;  %v1636_v24 = vmov 0.0  }
 0x116   :  { %v439_v4 = vmax.f32 %v373_v28, 0.0 }
 0x117   :  { %v438_v33 = vmax.f32 %v368_v32, 0.0  ;;  %v1334_v36 = vpop.f32.mrb[24].mxu0  ;;  %1513 = vrot.lane.b32.xlu1 %v1894_v10, %s1633_s0  ;;  %1402 = vmatprep.subr.bf16.mxu1 %v1401_v31 }
 0x118   :  { %v383_v37 = vadd.f32 %v1334_v36, %v1884_v56  ;;  %v377_v38 = vpop.f32.mrb[25].mxu0  ;;  %1404 = vmatpush3.bf16.msra.mxu1 %v1902_v19 }
 0x119   :  { %v1527_v39 = vpack.i.bf16 %v439_v4, %v438_v33  ;;  %v1405_v40 = vpack.c.bf16 %v439_v4, %v438_v33  ;;  %v378_v11 = vadd.f32 %v1884_v56, %v377_v38 }
 0x11a   :  { %v441_v41 = vmax.f32 %v383_v37, 0.0 }
 0x11b   :  { %v440_v44 = vmax.f32 %v378_v11, 0.0  ;;  %v1337_v48 = vpop.f32.mrb[26].mxu0  ;;  %1518 = vrot.lane.b32.xlu1 %v1517_v30, %s1633_s0  ;;  %1406 = vmatprep.subr.bf16.mxu1 %v1405_v40 }
 0x11c   :  { %v393_v49 = vadd.f32 %v1337_v48, %v1884_v56  ;;  %v387_v50 = vpop.f32.mrb[27].mxu0  ;;  %1408 = vmatpush3.bf16.msra.mxu1 %v1908_v27 }
 0x11d   :  { %v1537_v10 = vpack.i.bf16 %v441_v41, %v440_v44  ;;  %v1409_v51 = vpack.c.bf16 %v441_v41, %v440_v44  ;;  %v388_v52 = vadd.f32 %v1884_v56, %v387_v50 }
 0x11e   :  { %v443_v19 = vmax.f32 %v393_v49, 0.0 }
 0x11f   :  { %v442_v57 = vmax.f32 %v388_v52, 0.0  ;;  %v1340_v58 = vpop.f32.mrb[28].mxu0  ;;  %1523 = vrot.lane.b32.xlu1 %v1900_v18, %s1633_s0  ;;  %1410 = vmatprep.subr.bf16.mxu1 %v1409_v51 }
 0x120   :  { %v403_v59 = vadd.f32 %v1340_v58, %v1884_v56  ;;  %1538 = vrot.lane.b32.xlu0 %v1537_v10, %s1633_s0  ;;  %v397_v60 = vpop.f32.mrb[29].mxu0  ;;  %1412 = vmatpush3.bf16.msra.mxu1 %v1914_v35 }
 0x121   :  { %v1547_v61 = vpack.i.bf16 %v443_v19, %v442_v57  ;;  %v1413_v27 = vpack.c.bf16 %v443_v19, %v442_v57  ;;  %v398_v62 = vadd.f32 %v1884_v56, %v397_v60 }
 0x122   :  { %v445_v1 = vmax.f32 %v403_v59, 0.0 }
 0x123   :  { %v444_v2 = vmax.f32 %v398_v62, 0.0  ;;  %v1343_v3 = vpop.f32.mrb[30].mxu0  ;;  %1528 = vrot.lane.b32.xlu1 %v1527_v39, %s1633_s0  ;;  %1414 = vmatprep.subr.bf16.mxu1 %v1413_v27 }
 0x124   :  { %v413_v18 = vadd.f32 %v1343_v3, %v1884_v56  ;;  %1548 = vrot.lane.b32.xlu0 %v1547_v61, %s1633_s0  ;;  %v407_v5 = vpop.f32.mrb[31].mxu0  ;;  %1416 = vmatpush3.bf16.msra.mxu1 %v1920_v43 }
 0x125   :  { %v1557_v6 = vpack.i.bf16 %v445_v1, %v444_v2  ;;  %v1417_v7 = vpack.c.bf16 %v445_v1, %v444_v2  ;;  %v408_v35 = vadd.f32 %v1884_v56, %v407_v5  ;;  %v532_v56 = vld [vmem:[%s2121_s6] sm:$0xff] }
 0x126   :  { %v447_v8 = vmax.f32 %v413_v18, 0.0 }
 0x127   :  { %v446_v9 = vmax.f32 %v408_v35, 0.0  ;;  %1533 = vrot.lane.b32.xlu1 %v1906_v26, %s1633_s0  ;;  %1418 = vmatprep.subr.bf16.mxu1 %v1417_v7  ;;  %v533_v26 = vld [vmem:[%s2121_s6 + $0x8] sm:$0xff] }
 0x128   :  { %1558 = vrot.lane.b32.xlu0 %v1557_v6, %s1633_s0  ;;  %1420 = vmatpush3.bf16.msra.mxu1 %v1926_v55 }
 0x129   :  { %v1567_v12 = vpack.i.bf16 %v447_v8, %v446_v9  ;;  %v1421_v13 = vpack.c.bf16 %v447_v8, %v446_v9 }
 0x12b   :  { %1543 = vrot.lane.b32.xlu1 %v1912_v34, %s1633_s0  ;;  %1422 = vmatprep.subr.bf16.mxu1 %v1421_v13  ;;  %v1634_v34 = vmov 0.0|0.0  }
 0x12c   :  { %1568 = vrot.lane.b32.xlu0 %v1567_v12, %s1633_s0  ;;  %1424 = vmatpush3.bf16.msra.mxu1 %v1932_v0  ;;  %v534_v0 = vld [vmem:[%s2121_s6 + $0x10] sm:$0xff] }
 0x12d   :  { %1425 = vmatprep.subr.bf16.mxu1 %v1634_v34  ;;  %v1429_v17 = vpack.c.bf16 %v535_v14, %v534_v0 }
 0x12f   :  { %1553 = vrot.lane.b32.xlu1 %v1918_v42, %s1633_s0  ;;  %527 = vmatmul.mubr.f32.vlgmr.msra.gmra.mrb[0].mxu1 %v1878_v53  ;;  %v1426_v42 = vpack.c.bf16 %v533_v26, %v532_v56  ;;  %v1988_v53 = vpop.xlane.xlu0 %537 }
 0x130   :  { %1352 = vmatprep.mubr.msk.f32.mxu1 %vm1635_vm3, %v1636_v24 }
 0x131   :  { %1427 = vmatpush3.bf16.msra.mxu1 %v1426_v42 }
 0x132   :  { %1428 = vmatprep.subr.bf16.mxu1 %v1634_v34 }
 0x133   :  { %1563 = vrot.lane.b32.xlu1 %v1924_v54, %s1633_s0 }
 0x135   :  { %1430 = vmatpush3.bf16.msra.mxu1 %v1429_v17 }
 0x136   :  { %1431 = vmatprep.subr.bf16.mxu1 %v1634_v34 }
 0x137   :  { %1573 = vrot.lane.b32.xlu1 %v1930_v63, %s1633_s0 }
 0x161   :  { %v1504_v43 = vpop.permute.xlu1 %1503 }
 0x162   :  { %v1506_v54 = vunpack.i.h.bf16 %v1504_v43  ;;  %v1505_v55 = vunpack.i.l.bf16 %v1504_v43 }
 0x164   :  { %v1446_v22 = vpack.c.bf16 %v1506_v54, %v1505_v55 }
 0x181   :  { %v1499_v63 = vpop.permute.xlu0 %1498 }
 0x182   :  { %v1501_v15 = vunpack.i.h.bf16 %v1499_v63  ;;  %v1500_v16 = vunpack.i.l.bf16 %v1499_v63 }
 0x184   :  { %v1443_v21 = vpack.c.bf16 %v1501_v15, %v1500_v16 }
 0x185   :  { %v1509_v23 = vpop.permute.xlu1 %1508 }
 0x186   :  { %v1511_v25 = vunpack.i.h.bf16 %v1509_v23  ;;  %v1510_v28 = vunpack.i.l.bf16 %v1509_v23  ;;  %1445 = vmatprep.subr.msk.bf16.mxu0 %vm1998_vm2, %v1443_v21  ;;  %v623_v23 = vld [vmem:[%s2123_s8 + $0x8] sm:$0xff] }
 0x187   :  { %1448 = vmatpush3.bf16.xpose.msk.msra.mxu0 %vm1998_vm2, %v1446_v22  ;;  %v622_v22 = vld [vmem:[%s2123_s8] sm:$0xff] }
 0x188   :  { %v1449_v29 = vpack.c.bf16 %v1511_v25, %v1510_v28 }
 0x189   :  { %v1514_v30 = vpop.permute.xlu1 %1513 }
 0x18a   :  { %v1516_v31 = vunpack.i.h.bf16 %v1514_v30  ;;  %v1515_v32 = vunpack.i.l.bf16 %v1514_v30  ;;  %1451 = vmatprep.subr.msk.bf16.mxu0 %vm1998_vm2, %v1449_v29  ;;  %v1432_v29 = vpack.c.bf16 %v623_v23, %v622_v22 }
 0x18c   :  { %v1452_v4 = vpack.c.bf16 %v1516_v31, %v1515_v32  ;;  %v625_v31 = vld [vmem:[%s2123_s8 + $0x18] sm:$0xff] }
 0x18d   :  { %v1519_v33 = vpop.permute.xlu1 %1518  ;;  %v1435_v32 = vpack.c.bf16 %v625_v31, %v624_v20 }
 0x18e   :  { %v1521_v36 = vunpack.i.h.bf16 %v1519_v33  ;;  %v1520_v37 = vunpack.i.l.bf16 %v1519_v33 }
 0x18f   :  { %1454 = vmatpush3.bf16.xpose.msk.msra.mxu0 %vm1998_vm2, %v1452_v4  ;;  %v1115_v4 = vld [vmem:[%s2122_s7] ss:$0 sm:$0xff] }
 0x190   :  { %v1455_v38 = vpack.c.bf16 %v1521_v36, %v1520_v37  ;;  %v546_v33 = vmul.f32 %v1115_v4, %v1988_v53  ;;  %v707_v36 = vld [vmem:[%s2125_s10] sm:$0xff]  ;;  %v708_v37 = vld [vmem:[%s2125_s10 + $0x8] sm:$0xff]  ;;  %v709_v53 = vld [vmem:[%s2125_s10 + $0x10] sm:$0xff] }
 0x191   :  { %v1524_v39 = vpop.permute.xlu1 %1523 }
 0x192   :  { %v1526_v40 = vunpack.i.h.bf16 %v1524_v39  ;;  %v1525_v11 = vunpack.i.l.bf16 %v1524_v39  ;;  %1457 = vmatprep.subr.msk.bf16.mxu0 %vm1998_vm2, %v1455_v38  ;;  %v1539_v50 = vpop.permute.xlu0 %1538 }
 0x193   :  { %v1541_v52 = vunpack.i.h.bf16 %v1539_v50  ;;  %v1540_v19 = vunpack.i.l.bf16 %v1539_v50 }
 0x194   :  { %v1458_v41 = vpack.c.bf16 %v1526_v40, %v1525_v11  ;;  %v1438_v11 = vpack.c.bf16 %v708_v37, %v707_v36 }
 0x195   :  { %v1529_v44 = vpop.permute.xlu1 %1528  ;;  %v1467_v60 = vpack.c.bf16 %v1541_v52, %v1540_v19 }
 0x196   :  { %v1531_v48 = vunpack.i.h.bf16 %v1529_v44  ;;  %v1530_v49 = vunpack.i.l.bf16 %v1529_v44  ;;  %v1549_v27 = vpop.permute.xlu0 %1548 }
 0x197   :  { %1460 = vmatpush3.bf16.xpose.msk.msra.mxu0 %vm1998_vm2, %v1458_v41  ;;  %v1551_v2 = vunpack.i.h.bf16 %v1549_v27  ;;  %v1550_v3 = vunpack.i.l.bf16 %v1549_v27  ;;  %v1120_v41 = vld [vmem:[%s2126_s11] ss:$0 sm:$0xff] }
 0x198   :  { %v1461_v10 = vpack.c.bf16 %v1531_v48, %v1530_v49  ;;  %v710_v48 = vld [vmem:[%s2125_s10 + $0x18] sm:$0xff]  ;;  %s1637_s10 = smov [#allocation2]  }
 0x199   :  { %v1534_v51 = vpop.permute.xlu1 %1533  ;;  %v1473_v5 = vpack.c.bf16 %v1551_v2, %v1550_v3  ;;  %v1441_v50 = vpack.c.bf16 %v710_v48, %v709_v53  ;;  %s1060_s25 = sshll.u32 %s1637_s10, 4  ;;  %s1061_s25 = int_to_ptr.vmem [resolvable:$true] %s1060_s25 }
 0x19a   :  { %v1536_v57 = vunpack.i.h.bf16 %v1534_v51  ;;  %v1535_v58 = vunpack.i.l.bf16 %v1534_v51  ;;  %1463 = vmatprep.subr.msk.bf16.mxu0 %vm1998_vm2, %v1461_v10  ;;  %v1559_v7 = vpop.permute.xlu0 %1558  ;;  %v1117_v51 = vld [vmem:[%s2124_s9] ss:$0 sm:$0xff]  ;;  %s1585_s26 = scalar_lea.vmem %s1061_s25, 128  ;;  %p1590_p1 = scmp.lt.s32.totalorder %s1061_s25, %s1061_s25 }
 0x19b   :  { %v1561_v9 = vunpack.i.h.bf16 %v1559_v7  ;;  %v1560_v12 = vunpack.i.l.bf16 %v1559_v7  ;;  %p1586_p0 = scmp.ne.s32.totalorder %s1061_s25, %s1585_s26  ;;  %p1591_p2 = scmp.lt.s32.totalorder %s1585_s26, %s1585_s26 }
 0x19c   :  { %v1464_v59 = vpack.c.bf16 %v1536_v57, %v1535_v58 }
 0x19d   :  { %v1544_v61 = vpop.permute.xlu1 %1543  ;;  %v1479_v56 = vpack.c.bf16 %v1561_v9, %v1560_v12  ;;  %p1592_p3 = por %p1591_p2, %p1590_p1 }
 0x19e   :  { %v1546_v62 = vunpack.i.h.bf16 %v1544_v61  ;;  %v1545_v1 = vunpack.i.l.bf16 %v1544_v61  ;;  %v1569_v42 = vpop.permute.xlu0 %1568 }
 0x19f   :  { %1466 = vmatpush3.bf16.xpose.msk.msra.mxu0 %vm1998_vm2, %v1464_v59  ;;  %v1571_v55 = vunpack.i.h.bf16 %v1569_v42  ;;  %v1570_v63 = vunpack.i.l.bf16 %v1569_v42  ;;  %p1593_p4 = pnand %p1592_p3, %p1586_p0 }
 0x1a0   :  { %1469 = vmatprep.subr.msk.bf16.mxu0 %vm1998_vm2, %v1467_v60  ;;  %v1470_v18 = vpack.c.bf16 %v1546_v62, %v1545_v1 }
 0x1a1   :  { %v1554_v6 = vpop.permute.xlu1 %1553  ;;  %v1485_v14 = vpack.c.bf16 %v1571_v55, %v1570_v63 }
 0x1a2   :  { %v1556_v35 = vunpack.i.h.bf16 %v1554_v6  ;;  %v1555_v8 = vunpack.i.l.bf16 %v1554_v6 }
 0x1a4   :  { %v1476_v13 = vpack.c.bf16 %v1556_v35, %v1555_v8 }
 0x1a5   :  { %v1564_v26 = vpop.permute.xlu1 %1563 }
 0x1a6   :  { %v1566_v43 = vunpack.i.h.bf16 %v1564_v26  ;;  %v1565_v54 = vunpack.i.l.bf16 %v1564_v26 }
 0x1a7   :  { %1472 = vmatpush3.bf16.xpose.msk.msra.mxu0 %vm1998_vm2, %v1470_v18 }
 0x1a8   :  { %1475 = vmatprep.subr.msk.bf16.mxu0 %vm1998_vm2, %v1473_v5  ;;  %v1482_v0 = vpack.c.bf16 %v1566_v43, %v1565_v54 }
 0x1a9   :  { %v1574_v15 = vpop.permute.xlu1 %1573 }
 0x1aa   :  { %v1576_v16 = vunpack.i.h.bf16 %v1574_v15  ;;  %v1575_v17 = vunpack.i.l.bf16 %v1574_v15 }
 0x1ac   :  { %v1488_v21 = vpack.c.bf16 %v1576_v16, %v1575_v17 }
 0x1af   :  { %1478 = vmatpush3.bf16.xpose.msk.msra.mxu0 %vm1998_vm2, %v1476_v13 }
 0x1b0   :  { %1481 = vmatprep.subr.msk.bf16.mxu0 %vm1998_vm2, %v1479_v56 }
 0x1b7   :  { %1484 = vmatpush3.bf16.xpose.msk.msra.mxu0 %vm1998_vm2, %v1482_v0 }
 0x1b8   :  { %1487 = vmatprep.subr.msk.bf16.mxu0 %vm1998_vm2, %v1485_v14 }
 0x1bf   :  { %1490 = vmatpush3.bf16.xpose.msk.msra.mxu0 %vm1998_vm2, %v1488_v21 }
 0x202   :  { %v1228_v25 = vpop.f32.mrb[0].mxu1 }
 0x203   :  { %v1229_v28 = vpop.f32.mrb[1].mxu1 }
 0x204   :  { %v1230_v30 = vadd.f32 %v1229_v28, %v1228_v25 }
 0x206   :  { %1353 = vmatmul.mubr.msk.f32.vlgmr.msra.gmra.mrb[2].mxu1 %vm547_vm1, %v1230_v30 }
 0x207   :  { %1433 = vmatpush3.bf16.msra.mxu1 %v1432_v29  ;;  %1363 = vmatprep.mubr.msk.f32.mxu1 %vm1635_vm3, %v1636_v24 }
 0x208   :  { %1434 = vmatprep.subr.bf16.mxu1 %v1634_v34 }
 0x20b   :  { %1436 = vmatpush3.bf16.msra.mxu1 %v1435_v32 }
 0x20c   :  { %1437 = vmatprep.subr.bf16.mxu1 %v1634_v34 }
 0x2d9   :  { %v617_v38 = vpop.f32.mrb[2].mxu1 }
 0x2da   :  { %v618_v39 = vadd.f32 %v617_v38, %v546_v33  ;;  %v1354_v40 = vpop.f32.mrb[3].mxu1 }
 0x2dc   :  { %v621_v44 = vmax.f32 %v618_v39, 0.0 }
 0x2de   :  { %1364 = vmatmul.mubr.msk.f32.vlgmr.msra.gmra.mrb[4].mxu1 %vm547_vm1, %v621_v44  ;;  %v788_v49 = vmul.f32 %v1120_v41, %v621_v44 }
 0x2df   :  { %1439 = vmatpush3.bf16.msra.mxu1 %v1438_v11  ;;  %1374 = vmatprep.mubr.msk.f32.mxu1 %vm1635_vm3, %v1636_v24 }
 0x2e0   :  { %v789_v10 = vsel %vm547_vm1, %v788_v49, 0.0  ;;  %1440 = vmatprep.subr.bf16.mxu1 %v1634_v34 }
 0x2e1   :  { %790 = vadd.xlane.f32.xlu0 %v789_v10 }
 0x2e3   :  { %1442 = vmatpush3.bf16.msra.mxu1 %v1441_v50 }
 0x2e6   :  { %1375 = vmatmul.mubr.msk.f32.vlgmr.msra.gmra.mrb[6].mxu1 %vm547_vm1, %v621_v44 }
 0x3b1   :  { %v702_v52 = vpop.f32.mrb[4].mxu1 }
 0x3b2   :  { %v703_v19 = vadd.f32 %v1117_v51, %v702_v52  ;;  %v1365_v57 = vpop.f32.mrb[5].mxu1 }
 0x3b4   :  { %706 = vst [vmem:[#allocation2] sm:$0xff] %v703_v19 }
 0x3b9   :  { %v777_v58 = vpop.f32.mrb[6].mxu1 }
 0x3ba   :  { %v1376_v59 = vpop.f32.mrb[7].mxu1  ;;  %1278 = vmatprep.mubr.msk.f32.mxu0 %vm547_vm1, %v777_v58 }
 0x3bb   :  { %1279 = vmatmul.mubr.msk.f32.vlgmr.msra.gmra.mrb[32].mxu0 %vm547_vm1, %v777_v58 }
 0x3bc   :  { %1596 = shalt.err (!%p1593_p4)
}
 0x3bd   :  { %s1597_s28 = scalar_lea.hbm %s2127_s12, 128 }
 0x3be   :  { %p1598_p5 = scmp.ne.s32.totalorder %s2127_s12, %s1597_s28  ;;  %p1601_p6 = scmp.lt.u32.totalorder %s1597_s28, %s2127_s12 }
 0x3c0   :  { %p1603_p7 = pnand %p1601_p6, %p1598_p5 }
 0x3c2   :  { %1606 = shalt.err (!%p1603_p7)
}
 0x3c3   :  { %1063 = dma.vmem_to_hbm [thread:$0]  %s1061_s25, 128, %s2127_s12, [#allocation3]   ;;  %v1026_v34 = vld [vmem:[%s2118_s3] sm:$0x3]  ;;  %v791_v60 = vpop.xlane.xlu0 %790 }
 0x3c4   :  { %v1031_v24 = vrot.slane %v1026_v34, %v452_v46  ;;  %v1035_v27 = vrot.slane %v1026_v34, %v456_v47  ;;  %s1638_s3 = smov [#allocation4]  }
 0x3c5   :  { %s1070_s12 = sshll.u32 %s1638_s3, 4  ;;  %s1071_s12 = int_to_ptr.vmem [resolvable:$true] %s1070_s12 }
 0x3c6   :  { %s1607_s1 = scalar_lea.vmem %s1071_s12, 256  ;;  %p1612_p9 = scmp.lt.s32.totalorder %s1071_s12, %s1071_s12 }
 0x3c7   :  { %p1608_p8 = scmp.ne.s32.totalorder %s1071_s12, %s1607_s1  ;;  %p1613_p10 = scmp.lt.s32.totalorder %s1607_s1, %s1607_s1 }
 0x3c9   :  { %p1614_p11 = por %p1613_p10, %p1612_p9 }
 0x3cb   :  { %p1615_p12 = pnand %p1614_p11, %p1608_p8 }
 0x48e   :  { %v1021_v61 = vpop.f32.mrb[32].mxu0 }
 0x48f   :  { %v1022_v62 = vadd.f32 %v1021_v61, %v791_v60  ;;  %v1023_v1 = vpop.f32.mrb[33].mxu0 }
 0x490   :  { %v1024_v2 = vadd.f32 %v1023_v1, %v791_v60 }
 0x491   :  { %v1038_v3 = vmul.f32 %v1031_v24, %v1022_v62 }
 0x492   :  { %v1039_v18 = vmul.f32 %v1035_v27, %v1024_v2 }
 0x493   :  { %v1154_v5 = vmul.f32 -1.442695, %v1038_v3 }
 0x494   :  { %v1155_v6 = vmul.f32 -1.442695, %v1039_v18 }
 0x495   :  { %1577 = vpow2.f32 %v1154_v5 }
 0x496   :  { %1579 = vpow2.f32 %v1155_v6 }
 0x49f   :  { %v1578_v7 = vpop.eup %1577 }
 0x4a0   :  { %v1580_v35 = vpop.eup %1579  ;;  %v1046_v8 = vadd.f32 1.0, %v1578_v7 }
 0x4a1   :  { %v1047_v9 = vadd.f32 1.0, %v1580_v35 }
 0x4a2   :  { %1581 = vrcp.f32 %v1046_v8 }
 0x4a3   :  { %1583 = vrcp.f32 %v1047_v9 }
 0x4ac   :  { %v1582_v46 = vpop.eup %1581 }
 0x4ad   :  { %v1584_v45 = vpop.eup %1583  ;;  %1052 = vst [vmem:[#allocation4] sm:$0xff] %v1582_v46 }
 0x4ae   :  { %1053 = vst [vmem:[#allocation4 + $0x8] sm:$0xff] %v1584_v45 }
 0x4af   :  { %1618 = shalt.err (!%p1615_p12)
}
 0x4b0   :  { %s1619_s20 = scalar_lea.hbm %s2128_s13, 256 }
 0x4b1   :  { %p1620_p13 = scmp.ne.s32.totalorder %s2128_s13, %s1619_s20  ;;  %p1623_p0 = scmp.lt.u32.totalorder %s1619_s20, %s2128_s13 }
 0x4b3   :  { %p1625_p1 = pnand %p1623_p0, %p1620_p13 }
 0x4b5   :  { %1628 = shalt.err (!%p1625_p1)
}
 0x4b6   :  { %1073 = dma.vmem_to_hbm [thread:$0]  %s1071_s12, 256, %s2128_s13, [#allocation5]  }
 0x4b7   :  { %1629 = dma.done.wait [#allocation3], 128  }
 0x4b8   :  { %1630 = vsyncadd [#allocation3], 4294967168 }
 0x4b9   :  { %1631 = dma.done.wait [#allocation5], 256  }
 0x4ba   :  { %1632 = vsyncadd [#allocation5], 4294967040 }
 0x4bb   :  { %1080 = vsyncpa [#allocation3], 1 }
 0x4bc   :  { %1081 = vsyncpa [#allocation5], 1 }

</bundles_post_ra>
